<compile_context>
chip_gen: v6e
topology: v6e:2x2x1
jax: 0.10.0
libtpu: 0.0.40
codegen_flags: <defaults>
</compile_context>

<pallas_src>
import functools

import jax
import jax.numpy as jnp
from jax import lax
from jax.experimental import pallas as pl
from jax.experimental.pallas import tpu as pltpu

LANES = 128
ROW_ALIGN = 32                          # sublane-safe tile multiple for f32/bf16/int8
TARGET_BLOCK_BYTES = 2 * 1024 * 1024    # ~2 MiB per input block (near HBM roofline)
MAX_TILE_ROWS = 8192                    # bounds f32 intermediates for narrow dtypes
VMEM_LIMIT_BYTES = 48 * 1024 * 1024     # explicit budget; fits v5e/v6e/v7x


def _round_up(x, m):
    return (x + m - 1) // m * m


def _tensorcores_per_chip():
    """Best-effort detection of multi-TensorCore chips (v7x). Defaults to 1."""
    try:
        kind = (jax.devices()[0].device_kind or "").lower()
    except Exception:
        return 1
    return 2 if "v7" in kind else 1


def _focal_transform(log_p, gamma):
    if gamma == 0:   # static Python default: skip exp/pow entirely
        return log_p
    p = jnp.exp(-log_p)
    return (jnp.float32(1.0) - p) ** jnp.float32(gamma) * log_p


def _focal_partial_kernel(x_ref, t_ref, o_ref, acc_ref, *, steps_per_split,
                          tile_rows, groups, valid_rows, needs_mask):
    c = pl.program_id(0)   # split (maps to a TensorCore on v7x)
    i = pl.program_id(1)   # reduction step within the split

    @pl.when(i == 0)
    def _init():
        acc_ref[...] = jnp.zeros_like(acc_ref)

    # Upcast per-tile on the VPU (keeps HBM traffic at the input dtype width).
    x = x_ref[...].astype(jnp.float32)
    t = t_ref[...].astype(jnp.float32)
    d = x - t
    dd = d * d                                   # (tile_rows, 128) f32

    def _accumulate(vals):
        # (tile_rows,128)->(groups,8,128) is (8,128)-tile aligned => free
        # re-view; the leading-axis sum is straight vreg-wise VPU accumulation.
        acc_ref[...] += vals.reshape(groups, 8, LANES).sum(axis=0)

    if not needs_mask:
        _accumulate(dd)
    else:
        # Only the boundary / duplicated tile pays for the mask.
        row0 = (c * steps_per_split + i) * tile_rows

        @pl.when(row0 + tile_rows <= valid_rows)
        def _interior():
            _accumulate(dd)

        @pl.when(row0 + tile_rows > valid_rows)
        def _boundary():
            row_idx = row0 + lax.broadcasted_iota(
                jnp.int32, (tile_rows, LANES), 0)
            _accumulate(jnp.where(row_idx < valid_rows, dd, jnp.float32(0.0)))

    # Fold the cross-lane reduction into the last step (off the hot path):
    # each split emits one raw partial sum.
    @pl.when(i == steps_per_split - 1)
    def _finalize():
        part = acc_ref[...].sum(axis=0, keepdims=True)   # (1, 128) sublane reduce
        o_ref[...] = part.sum(axis=1, keepdims=True)     # (1, 1)   lane reduce


def focal_loss(inputs, target, *, gamma=0.0, eps=1e-7,
               target_block_bytes=TARGET_BLOCK_BYTES, num_splits=None):
    """Pallas TPU implementation of FocalLoss.forward. Returns an f32 scalar."""
    del eps  # the reference forward pass never uses eps
    assert inputs.shape == target.shape
    n_elements = inputs.size

    x = inputs.reshape(-1)
    t = target.reshape(-1)

    # Ragged tail (< 128 elements): fold it in with a tiny jnp expression
    # instead of jnp.pad-copying both full inputs in HBM.
    rem = n_elements % LANES
    aligned = n_elements - rem
    if rem:
        tx = x[aligned:].astype(jnp.float32)
        tt = t[aligned:].astype(jnp.float32)
        td = tx - tt
        tail_sum = jnp.sum(td * td)
        if aligned == 0:
            # Entire input is smaller than one lane row: pure-jnp fallback.
            return _focal_transform(tail_sum / jnp.float32(n_elements), gamma)
        x = x[:aligned]
        t = t[:aligned]

    rows = aligned // LANES
    x = x.reshape(rows, LANES)   # free layout reinterpretation
    t = t.reshape(rows, LANES)

    # Tile sizing: ~2 MiB per input block, scaled by dtype width (bf16 gets 2x
    # the rows of f32), multiple of 32 sublanes, never larger than needed.
    itemsize = max(x.dtype.itemsize, t.dtype.itemsize)
    tile_rows = target_block_bytes // (LANES * itemsize)
    tile_rows = max(ROW_ALIGN, min(tile_rows, MAX_TILE_ROWS,
                                   _round_up(rows, ROW_ALIGN)))
    tile_rows = _round_up(tile_rows, ROW_ALIGN)
    groups = tile_rows // 8

    total_steps = pl.cdiv(rows, tile_rows)

    # Only split the leading axis on multi-TensorCore chips (v7x); on
    # single-core chips a split just wastes a duplicated masked tile.
    cores = _tensorcores_per_chip()
    if num_splits is None:
        num_splits = cores if cores > 1 else 1
    num_splits = max(1, min(num_splits, total_steps))
    steps_per_split = pl.cdiv(total_steps, num_splits)
    covered_rows = num_splits * steps_per_split * tile_rows
    needs_mask = covered_rows > rows
    max_block = total_steps - 1

    if needs_mask:
        def in_index_map(c, i):
            # Never start a DMA past the array edge; OOB / duplicated rows are
            # zeroed by the (pl.when-gated) in-kernel mask.
            return (jnp.minimum(c * steps_per_split + i, max_block), 0)
    else:
        def in_index_map(c, i):
            return (c * steps_per_split + i, 0)

    kernel = functools.partial(
        _focal_partial_kernel,
        steps_per_split=steps_per_split,
        tile_rows=tile_rows,
        groups=groups,
        valid_rows=rows,
        needs_mask=needs_mask,
    )

    use_core_parallel = (cores > 1) and (num_splits == cores)
    lead_sem = pltpu.CORE_PARALLEL if use_core_parallel else "arbitrary"

    partials = pl.pallas_call(
        kernel,
        out_shape=jax.ShapeDtypeStruct((num_splits, 1, 1), jnp.float32),
        grid_spec=pltpu.PrefetchScalarGridSpec(
            num_scalar_prefetch=0,
            grid=(num_splits, steps_per_split),
            in_specs=[
                pl.BlockSpec((tile_rows, LANES), in_index_map),
                pl.BlockSpec((tile_rows, LANES), in_index_map),
            ],
            out_specs=pl.BlockSpec((None, 1, 1), lambda c, i: (c, 0, 0)),
            scratch_shapes=[pltpu.VMEM((8, LANES), jnp.float32)],
        ),
        compiler_params=pltpu.CompilerParams(
            dimension_semantics=(lead_sem, "arbitrary"),
            vmem_limit_bytes=VMEM_LIMIT_BYTES,
        ),
    )(x, t)

    # Tiny scalar epilogue: combine per-split partial sums (+ ragged tail).
    total = jnp.sum(partials)
    if rem:
        total = total + tail_sum
    log_p = total / jnp.float32(n_elements)
    return _focal_transform(log_p, gamma)


def focal_loss_ref(inputs, target, *, gamma=0.0):
    log_p = jnp.mean((inputs.astype(jnp.float32) - target.astype(jnp.float32)) ** 2)
    p = jnp.exp(-log_p)
    return (1.0 - p) ** gamma * log_p


if __name__ == "__main__":
    key = jax.random.PRNGKey(0)
    counter = 0

    def _check(shape, gamma, dtype=jnp.float32, **kwargs):
        global counter
        counter += 1
        k1, k2 = jax.random.split(jax.random.fold_in(key, counter))
        a = jax.random.normal(k1, shape, dtype=dtype)
        b = jax.random.normal(k2, shape, dtype=dtype)
        out = jax.block_until_ready(focal_loss(a, b, gamma=gamma, **kwargs))
        ref = focal_loss_ref(a, b, gamma=gamma)
        assert jnp.allclose(out, ref, rtol=1e-4, atol=1e-6), (shape, gamma, out, ref)

    # Primary NCHW case (module defaults, gamma=0).
    _check((2, 4, 16, 16), gamma=0.0)
    # Non-default gamma exercises the focal transform branch.
    _check((2, 4, 16, 16), gamma=2.0)
    # bf16 inputs: in-kernel upcast path, half the HBM traffic.
    _check((2, 4, 16, 16), gamma=0.0, dtype=jnp.bfloat16)
    # Ragged size: jnp tail fold-in + partial-tile masking path.
    _check((3, 5, 9, 7), gamma=0.0)
    # Multi-step grid: interior (unmasked) tiles + one masked boundary tile.
    _check((2, 4, 256, 260), gamma=0.0)
    # Explicit 2-way split with an odd step count: fully-masked duplicated tile.
    _check((2, 4, 512, 260), gamma=0.0, num_splits=2)

    print("KERNEL_OK")
</pallas_src>

<mosaic_0001>
module attributes {stable_mosaic.version = 11 : i64} {
  func.func @_focal_partial_kernel(%arg0: i32, %arg1: i32, %arg2: memref<32x128xf32, #tpu.memory_space<vmem>>, %arg3: memref<32x128xf32, #tpu.memory_space<vmem>>, %arg4: memref<1x1x1xf32, #tpu.memory_space<vmem>>, %arg5: memref<8x128xf32, #tpu.memory_space<vmem>>) attributes {dimension_semantics = [#tpu.dimension_semantics<arbitrary>, #tpu.dimension_semantics<arbitrary>], iteration_bounds = array<i64: 1, 1>, scalar_prefetch = 0 : i64, scratch_operands = 1 : i64, tpu.core_type = #tpu.core_type<tc>, window_params = [{transform_indices = @transform_0, window_bounds = array<i64: 32, 128>}, {transform_indices = @transform_1, window_bounds = array<i64: 32, 128>}, {transform_indices = @transform_2, window_bounds = array<i64: 1, 1, 1>}]} {
    %c0_i32 = arith.constant 0 : i32
    %0 = arith.cmpi eq, %arg1, %c0_i32 : i32
    %1 = arith.extui %0 : i1 to i32
    %c0_i32_0 = arith.constant 0 : i32
    %2 = arith.cmpi ne, %1, %c0_i32_0 : i32
    scf.if %2 {
      %cst = arith.constant 0.000000e+00 : f32
      %21 = vector.broadcast %cst : f32 to vector<8x128xf32>
      %c0_11 = arith.constant 0 : index
      %c0_12 = arith.constant 0 : index
      %22 = vector.load %arg5[%c0_11, %c0_12] : memref<8x128xf32, #tpu.memory_space<vmem>>, vector<8x128xf32>
      tpu.vector_store %arg5[%c0_11, %c0_12], %21 {strides = array<i32>} : memref<8x128xf32, #tpu.memory_space<vmem>>, vector<8x128xf32>,
    } else {
    }
    %c0 = arith.constant 0 : index
    %c0_1 = arith.constant 0 : index
    %3 = vector.load %arg2[%c0, %c0_1] : memref<32x128xf32, #tpu.memory_space<vmem>>, vector<32x128xf32>
    %c0_2 = arith.constant 0 : index
    %c0_3 = arith.constant 0 : index
    %4 = vector.load %arg3[%c0_2, %c0_3] : memref<32x128xf32, #tpu.memory_space<vmem>>, vector<32x128xf32>
    %5 = arith.subf %3, %4 : vector<32x128xf32>
    %6 = arith.mulf %5, %5 : vector<32x128xf32>
    %c1_i32 = arith.constant 1 : i32
    %7 = arith.muli %arg0, %c1_i32 : i32
    %8 = arith.addi %7, %arg1 : i32
    %c32_i32 = arith.constant 32 : i32
    %9 = arith.muli %8, %c32_i32 : i32
    %c32_i32_4 = arith.constant 32 : i32
    %10 = arith.addi %9, %c32_i32_4 : i32
    %c16_i32 = arith.constant 16 : i32
    %11 = arith.cmpi sle, %10, %c16_i32 : i32
    %12 = arith.extui %11 : i1 to i32
    %c0_i32_5 = arith.constant 0 : i32
    %13 = arith.cmpi ne, %12, %c0_i32_5 : i32
    scf.if %13 {
      %c0_11 = arith.constant 0 : index
      %c0_12 = arith.constant 0 : index
      %21 = vector.load %arg5[%c0_11, %c0_12] : memref<8x128xf32, #tpu.memory_space<vmem>>, vector<8x128xf32>
      %22 = vector.shape_cast %6 : vector<32x128xf32> to vector<4x8x128xf32>
      %cst = arith.constant dense<0.000000e+00> : vector<8x128xf32>
      %23 = vector.multi_reduction <add>, %22, %cst [0] : vector<4x8x128xf32> to vector<8x128xf32>
      %24 = arith.addf %21, %23 : vector<8x128xf32>
      %c0_13 = arith.constant 0 : index
      %c0_14 = arith.constant 0 : index
      %25 = vector.load %arg5[%c0_13, %c0_14] : memref<8x128xf32, #tpu.memory_space<vmem>>, vector<8x128xf32>
      tpu.vector_store %arg5[%c0_13, %c0_14], %24 {strides = array<i32>} : memref<8x128xf32, #tpu.memory_space<vmem>>, vector<8x128xf32>,
    } else {
    }
    %c32_i32_6 = arith.constant 32 : i32
    %14 = arith.addi %9, %c32_i32_6 : i32
    %c16_i32_7 = arith.constant 16 : i32
    %15 = arith.cmpi sgt, %14, %c16_i32_7 : i32
    %16 = arith.extui %15 : i1 to i32
    %c0_i32_8 = arith.constant 0 : i32
    %17 = arith.cmpi ne, %16, %c0_i32_8 : i32
    scf.if %17 {
      %21 = tpu.iota {dimensions = array<i32: 0>} : vector<32x128xi32>
      %22 = vector.broadcast %9 : i32 to vector<32x128xi32>
      %23 = arith.addi %22, %21 : vector<32x128xi32>
      %c16_i32_11 = arith.constant 16 : i32
      %24 = vector.broadcast %c16_i32_11 : i32 to vector<32x128xi32>
      %25 = arith.cmpi slt, %23, %24 : vector<32x128xi32>
      %cst = arith.constant 0.000000e+00 : f32
      %26 = vector.broadcast %cst : f32 to vector<32x128xf32>
      %27 = arith.select %25, %6, %26 : vector<32x128xi1>, vector<32x128xf32>
      %c0_12 = arith.constant 0 : index
      %c0_13 = arith.constant 0 : index
      %28 = vector.load %arg5[%c0_12, %c0_13] : memref<8x128xf32, #tpu.memory_space<vmem>>, vector<8x128xf32>
      %29 = vector.shape_cast %27 : vector<32x128xf32> to vector<4x8x128xf32>
      %cst_14 = arith.constant dense<0.000000e+00> : vector<8x128xf32>
      %30 = vector.multi_reduction <add>, %29, %cst_14 [0] : vector<4x8x128xf32> to vector<8x128xf32>
      %31 = arith.addf %28, %30 : vector<8x128xf32>
      %c0_15 = arith.constant 0 : index
      %c0_16 = arith.constant 0 : index
      %32 = vector.load %arg5[%c0_15, %c0_16] : memref<8x128xf32, #tpu.memory_space<vmem>>, vector<8x128xf32>
      tpu.vector_store %arg5[%c0_15, %c0_16], %31 {strides = array<i32>} : memref<8x128xf32, #tpu.memory_space<vmem>>, vector<8x128xf32>,
    } else {
    }
    %c0_i32_9 = arith.constant 0 : i32
    %18 = arith.cmpi eq, %arg1, %c0_i32_9 : i32
    %19 = arith.extui %18 : i1 to i32
    %c0_i32_10 = arith.constant 0 : i32
    %20 = arith.cmpi ne, %19, %c0_i32_10 : i32
    scf.if %20 {
      %c0_11 = arith.constant 0 : index
      %c0_12 = arith.constant 0 : index
      %21 = vector.load %arg5[%c0_11, %c0_12] : memref<8x128xf32, #tpu.memory_space<vmem>>, vector<8x128xf32>
      %cst = arith.constant dense<0.000000e+00> : vector<128xf32>
      %22 = vector.multi_reduction <add>, %21, %cst [0] : vector<8x128xf32> to vector<128xf32>
      %23 = vector.shape_cast %22 : vector<128xf32> to vector<1x128xf32>
      %cst_13 = arith.constant dense<0.000000e+00> : vector<1xf32>
      %24 = vector.multi_reduction <add>, %23, %cst_13 [1] : vector<1x128xf32> to vector<1xf32>
      %25 = vector.shape_cast %24 : vector<1xf32> to vector<1x1xf32>
      %c0_14 = arith.constant 0 : index
      %c0_15 = arith.constant 0 : index
      %c0_16 = arith.constant 0 : index
      %26 = vector.load %arg4[%c0_14, %c0_15, %c0_16] : memref<1x1x1xf32, #tpu.memory_space<vmem>>, vector<1x1x1xf32>
      %27 = vector.shape_cast %26 : vector<1x1x1xf32> to vector<1x1xf32>
      %28 = vector.shape_cast %25 : vector<1x1xf32> to vector<1x1x1xf32>
      tpu.vector_store %arg4[%c0_14, %c0_15, %c0_16], %28 {strides = array<i32>} : memref<1x1x1xf32, #tpu.memory_space<vmem>>, vector<1x1x1xf32>,
    } else {
    }
    return
  }
  func.func @transform_0(%arg0: i32, %arg1: i32) -> (i32, i32) {
    %c1_i32 = arith.constant 1 : i32
    %0 = arith.muli %arg0, %c1_i32 : i32
    %1 = arith.addi %0, %arg1 : i32
    %c0_i32 = arith.constant 0 : i32
    %2 = arith.minsi %1, %c0_i32 : i32
    %c0_i32_0 = arith.constant 0 : i32
    %c0_i32_1 = arith.constant 0 : i32
    return %2, %c0_i32_0 : i32, i32
  }
  func.func @transform_1(%arg0: i32, %arg1: i32) -> (i32, i32) {
    %c1_i32 = arith.constant 1 : i32
    %0 = arith.muli %arg0, %c1_i32 : i32
    %1 = arith.addi %0, %arg1 : i32
    %c0_i32 = arith.constant 0 : i32
    %2 = arith.minsi %1, %c0_i32 : i32
    %c0_i32_0 = arith.constant 0 : i32
    %c0_i32_1 = arith.constant 0 : i32
    return %2, %c0_i32_0 : i32, i32
  }
  func.func @transform_2(%arg0: i32, %arg1: i32) -> (i32, i32, i32) {
    %c0_i32 = arith.constant 0 : i32
    %c0_i32_0 = arith.constant 0 : i32
    %c0_i32_1 = arith.constant 0 : i32
    return %arg0, %c0_i32, %c0_i32_0 : i32, i32, i32
  }
}

</mosaic_0001>

<bundles_post_ra>
// kernel: tpu_custom_call.1
= control target key start
LH: loop header
LB: loop body
LE: loop exit
PB: predicated region body
PF: predicated region fallthrough
CT: control target
= control target key end

     0   :  { %7 = vsyncpa [#allocation4], 0  ;;  %s268_s0 = inlined_call_operand.hbm [shape: f32[16,128], index: 0, kind: input, shape index: {}]   ;;  %s269_s1 = inlined_call_operand.hbm [shape: f32[16,128], index: 1, kind: input, shape index: {}]   ;;  %s270_s2 = inlined_call_operand.hbm [shape: f32[1,1,1], index: 2, kind: output, shape index: {}]  }
   0x1   :  { %8 = vsyncpa [#allocation7], 0 }
   0x2   :  { %9 = vsyncpa [#allocation5], 0 }
   0x3   :  { %20 = vsyncadd [#allocation4], 256  ;;  %s239_s9 = smov [#allocation3]  }
   0x4   :  { %s25_s10 = sshll.u32 %s239_s9, 4  ;;  %s26_s10 = int_to_ptr.vmem [resolvable:$true] %s25_s10 }
   0x5   :  { %s181_s11 = scalar_lea.vmem %s26_s10, 256  ;;  %s185_s12 = scalar_lea.vmem %s26_s10, 512 }
   0x6   :  { %p182_p0 = scmp.ne.s32.totalorder %s26_s10, %s181_s11  ;;  %p186_p1 = scmp.lt.s32.totalorder %s26_s10, %s26_s10 }
   0x7   :  { %p187_p2 = scmp.lt.s32.totalorder %s185_s12, %s181_s11 }
   0x9   :  { %p188_p3 = por %p187_p2, %p186_p1 }
   0xb   :  { %p189_p4 = pnand %p188_p3, %p182_p0 }
   0xd   :  { %192 = shalt.err (!%p189_p4)
}
   0xe   :  { %s240_s13 = smov 128   ;;  %s241_s14 = smov 8  }
   0xf   :  { %31 = dma.hbm_to_vmem [thread:$0]  %s268_s0, 256, %s26_s10, [#allocation4], %s240_s13, %s240_s13, %s241_s14  }
  0x10   :  { %42 = vsyncadd [#allocation7], 256  ;;  %s242_s17 = smov [#allocation6]  }
  0x11   :  { %s47_s18 = sshll.u32 %s242_s17, 4  ;;  %s48_s18 = int_to_ptr.vmem [resolvable:$true] %s47_s18 }
  0x12   :  { %s201_s19 = scalar_lea.vmem %s48_s18, 256  ;;  %s205_s20 = scalar_lea.vmem %s48_s18, 512 }
  0x13   :  { %p202_p5 = scmp.ne.s32.totalorder %s48_s18, %s201_s19  ;;  %p206_p6 = scmp.lt.s32.totalorder %s48_s18, %s48_s18 }
  0x14   :  { %p207_p7 = scmp.lt.s32.totalorder %s205_s20, %s201_s19 }
  0x16   :  { %p208_p8 = por %p207_p7, %p206_p6 }
  0x18   :  { %p209_p9 = pnand %p208_p8, %p202_p5 }
  0x1a   :  { %212 = shalt.err (!%p209_p9)
}
  0x1b   :  { %53 = dma.hbm_to_vmem [thread:$0]  %s269_s1, 256, %s48_s18, [#allocation7], %s240_s13, %s240_s13, %s241_s14  }
  0x1c   :  { %233 = dma.done.wait [#allocation4], 512  }
  0x1d   :  { %234 = vsyncadd [#allocation4], 4294966784 }
  0x1e   :  { %235 = dma.done.wait [#allocation7], 512  }
  0x1f   :  { %236 = vsyncadd [#allocation7], 4294966784  ;;  %v77_v0 = vld [vmem:[#allocation3] sm:$0xff]  ;;  %v78_v1 = vld [vmem:[#allocation3 + $0x8] sm:$0xff]  ;;  %s243_s0 = smov [#allocation8]   ;;  %vm146_vm0 = vcmask 0  }
  0x20   :  { %v81_v2 = vld [vmem:[#allocation6] sm:$0xff]  ;;  %v82_v3 = vld [vmem:[#allocation6 + $0x8] sm:$0xff]  ;;  %s154_s1 = sshll.u32 %s243_s0, 4  ;;  %s155_s1 = int_to_ptr.vmem [resolvable:$true] %s154_s1 }
  0x21   :  { %v85_v4 = vsub.f32 %v77_v0, %v81_v2  ;;  %v86_v5 = vsub.f32 %v78_v1, %v82_v3  ;;  %s213_s23 = scalar_lea.vmem %s155_s1, 16  ;;  %s217_s24 = scalar_lea.vmem %s155_s1, 32 }
  0x22   :  { %p214_p10 = scmp.ne.s32.totalorder %s155_s1, %s213_s23  ;;  %p218_p11 = scmp.lt.s32.totalorder %s155_s1, %s155_s1 }
  0x23   :  { %v89_v6 = vmul.f32 %v85_v4, %v85_v4  ;;  %v90_v7 = vmul.f32 %v86_v5, %v86_v5  ;;  %p219_p12 = scmp.lt.s32.totalorder %s217_s24, %s213_s23 }
  0x25   :  { %v129_v8 = vadd.f32 %v90_v7, %v89_v6  ;;  %p220_p13 = por %p219_p12, %p218_p11 }
  0x27   :  { %v138_v9 = vrot.slane %v129_v8, 4  ;;  %p221_p0 = pnand %p220_p13, %p214_p10 }
  0x29   :  { %v139_v10 = vadd.f32 %v138_v9, %v129_v8 }
  0x2b   :  { %v140_v11 = vrot.slane %v139_v10, 2 }
  0x2d   :  { %v141_v12 = vadd.f32 %v140_v11, %v139_v10 }
  0x2f   :  { %v142_v13 = vrot.slane %v141_v12, 1 }
  0x31   :  { %v143_v14 = vadd.f32 %v142_v13, %v141_v12 }
  0x33   :  { %144 = vadd.xlane.f32.xlu0 %v143_v14 }
  0xbc   :  { %v145_v15 = vpop.xlane.xlu0 %144 }
  0xbd   :  { %147 = vst.msk [vmem:[#allocation8] sm:$0x1] %vm146_vm0, %v145_v15 }
  0xbe   :  { %224 = shalt.err (!%p221_p0)
}
  0xbf   :  { %157 = dma.vmem_to_hbm [thread:$0]  %s155_s1, 16, %s270_s2, [#allocation5]  }
  0xc0   :  { %237 = dma.done.wait [#allocation5], 16  }
  0xc1   :  { %238 = vsyncadd [#allocation5], 4294967280 }
  0xc2   :  { %161 = vsyncpa [#allocation4], 1 }
  0xc3   :  { %162 = vsyncpa [#allocation7], 1 }
  0xc4   :  { %163 = vsyncpa [#allocation5], 1 }

</bundles_post_ra>
